<compile_context>
chip_gen: v6e
topology: v6e:2x2x1
jax: 0.10.0
libtpu: 0.0.40
codegen_flags: <defaults>
</compile_context>

<pallas_src>
import jax
import jax.numpy as jnp
from jax.experimental import pallas as pl
from jax.experimental.pallas import tpu as pltpu


def _mult_cmd_emb_kernel(num_ref, ctype_ref, ccont_ref, utype_ref,
                         ctab_ref, utab_ref, out_ref):
    """Per-program: one batch element, all (padded) N unit rows.

    num_ref   : [B]        int32   (SMEM, scalar-prefetched)
    ctype_ref : [N, 1]     int32   (VMEM block)
    ccont_ref : [N, 1]     int32
    utype_ref : [N, 1]     int32
    ctab_ref  : [C, E_pad] float32 (full table)
    utab_ref  : [U, E_pad] float32
    out_ref   : [1, 1, E_pad] float32
    """
    b = pl.program_id(0)
    N = ctype_ref.shape[0]
    C = ctab_ref.shape[0]
    U = utab_ref.shape[0]

    num_b = num_ref[b]                                   # scalar int32 (SMEM)

    ctype = ctype_ref[...]                               # [N, 1] int32
    utype = utype_ref[...]                               # [N, 1] int32
    ccont = ccont_ref[...].astype(jnp.float32)           # [N, 1] float32

    # Per-row scale = (1 - ccont) * (unit is valid).  Folded into the ctype
    # one-hot so no extra [N, E] elementwise multiply and no mask matmul.
    unit_idx = jax.lax.broadcasted_iota(jnp.int32, (N, 1), 0)
    valid = (unit_idx < num_b).astype(jnp.float32)       # [N, 1]
    scale = (1.0 - ccont) * valid                        # [N, 1]

    # Embedding lookups as one-hot matmuls on the MXU.
    iota_c = jax.lax.broadcasted_iota(jnp.int32, (N, C), 1)
    onehot_c = (iota_c == ctype).astype(jnp.float32) * scale     # [N, C]
    c_emb = jnp.dot(onehot_c, ctab_ref[...],
                    preferred_element_type=jnp.float32)          # [N, E_pad]

    iota_u = jax.lax.broadcasted_iota(jnp.int32, (N, U), 1)
    onehot_u = (iota_u == utype).astype(jnp.float32)             # [N, U]
    u_emb = jnp.dot(onehot_u, utab_ref[...],
                    preferred_element_type=jnp.float32)          # [N, E_pad]

    # Masked per-batch sum over the unit axis = plain sublane reduction.
    red = jnp.sum(c_emb * u_emb, axis=0, keepdims=True)          # [1, E_pad]
    out_ref[...] = red.reshape(out_ref.shape)                    # [1, 1, E_pad]


def mult_cmd_embedding(ctype, ccont, utype, num_unit, ctype_table, utype_table):
    """Wrapper: pad to lane/sublane-friendly shapes, grid over batch."""
    B, N = ctype.shape
    C, E = ctype_table.shape
    U = utype_table.shape[0]

    LANE, SUB = 128, 8
    E_pad = ((E + LANE - 1) // LANE) * LANE              # lane-dense output
    N_pad = ((N + SUB - 1) // SUB) * SUB                 # sublane-aligned rows

    # Zero-pad embedding tables on the lane (embedding) axis.
    ctab = jnp.zeros((C, E_pad), jnp.float32).at[:, :E].set(
        ctype_table.astype(jnp.float32))
    utab = jnp.zeros((U, E_pad), jnp.float32).at[:, :E].set(
        utype_table.astype(jnp.float32))

    def pad_and_flatten(x):
        x = x.astype(jnp.int32)
        if N_pad != N:
            # Padded unit rows are masked out by (unit_idx < num_unit).
            x = jnp.pad(x, ((0, 0), (0, N_pad - N)))
        return x.reshape(B * N_pad, 1)

    ctype_f = pad_and_flatten(ctype)
    ccont_f = pad_and_flatten(ccont)
    utype_f = pad_and_flatten(utype)
    num_f = num_unit.astype(jnp.int32)                   # (B,) -> SMEM prefetch

    cost = pl.CostEstimate(
        flops=2 * B * N_pad * (C + U) * E_pad,
        transcendentals=0,
        bytes_accessed=4 * ((C + U) * E_pad + 3 * B * N_pad + B + B * E_pad),
    )

    out = pl.pallas_call(
        _mult_cmd_emb_kernel,
        out_shape=jax.ShapeDtypeStruct((B, 1, E_pad), jnp.float32),
        grid_spec=pltpu.PrefetchScalarGridSpec(
            num_scalar_prefetch=1,
            grid=(B,),
            in_specs=[
                pl.BlockSpec((N_pad, 1), lambda b, num: (b, 0)),
                pl.BlockSpec((N_pad, 1), lambda b, num: (b, 0)),
                pl.BlockSpec((N_pad, 1), lambda b, num: (b, 0)),
                pl.BlockSpec((C, E_pad), lambda b, num: (0, 0)),
                pl.BlockSpec((U, E_pad), lambda b, num: (0, 0)),
            ],
            out_specs=pl.BlockSpec((1, 1, E_pad), lambda b, num: (b, 0, 0)),
        ),
        compiler_params=pltpu.CompilerParams(
            dimension_semantics=("parallel",)),
        cost_estimate=cost,
    )(num_f, ctype_f, ccont_f, utype_f, ctab, utab)

    return out[:, 0, :E]                                 # strip lane padding


def _reference(ctype, ccont, utype, num_unit, ctab, utab):
    """Plain-JAX reference mirroring the PyTorch forward."""
    c_emb = ctab[ctype]                                   # [B, N, E]
    u_emb = utab[utype]                                   # [B, N, E]
    not_cont = (1.0 - ccont.astype(jnp.float32))[..., None]
    emb = c_emb * not_cont * u_emb                        # [B, N, E]
    unit_idx = jnp.arange(ctype.shape[1])[None, :]        # [1, N]
    mask = (unit_idx < num_unit[:, None]).astype(jnp.float32)[..., None]
    return jnp.sum(emb * mask, axis=1)                    # [B, E]


if __name__ == "__main__":
    # Small, module-consistent shapes.
    num_ctype, num_utype, emb_dim = 16, 16, 32
    B, N = 2, 8

    key = jax.random.PRNGKey(0)
    k_ct, k_ut, k_cc, k_i0, k_i1, k_i2 = jax.random.split(key, 6)

    # Deterministic "Embedding" weights (nn.Embedding default ~ N(0, 1)).
    ctype_table = jax.random.normal(k_ct, (num_ctype, emb_dim), jnp.float32)
    utype_table = jax.random.normal(k_ut, (num_utype, emb_dim), jnp.float32)
    # ccont_emb table exists in the module but its lookup is unused by forward.
    _ccont_table = jax.random.normal(k_cc, (2, emb_dim), jnp.float32)

    ctype = jax.random.randint(k_i0, (B, N), 0, num_ctype, jnp.int32)
    utype = jax.random.randint(k_i1, (B, N), 0, num_utype, jnp.int32)
    ccont = jax.random.randint(k_i2, (B, N), 0, 2, jnp.int32)
    num_unit = jnp.array([5, 8], dtype=jnp.int32)

    out = mult_cmd_embedding(ctype, ccont, utype, num_unit,
                             ctype_table, utype_table)
    out = jax.block_until_ready(out)

    ref = _reference(ctype, ccont, utype, num_unit, ctype_table, utype_table)
    assert out.shape == (B, emb_dim)
    assert jnp.allclose(out, ref, atol=1e-5, rtol=1e-5), "mismatch vs reference"

    print("KERNEL_OK")
</pallas_src>

<mosaic_0001>
module attributes {stable_mosaic.version = 11 : i64} {
  func.func @_mult_cmd_emb_kernel(%arg0: i32, %arg1: memref<2xi32, #tpu.memory_space<smem>>, %arg2: memref<8x1xi32, #tpu.memory_space<vmem>>, %arg3: memref<8x1xi32, #tpu.memory_space<vmem>>, %arg4: memref<8x1xi32, #tpu.memory_space<vmem>>, %arg5: memref<16x128xf32, #tpu.memory_space<vmem>>, %arg6: memref<16x128xf32, #tpu.memory_space<vmem>>, %arg7: memref<1x1x128xf32, #tpu.memory_space<vmem>>) attributes {dimension_semantics = [#tpu.dimension_semantics<parallel>], iteration_bounds = array<i64: 2>, scalar_prefetch = 1 : i64, scratch_operands = 0 : i64, tpu.core_type = #tpu.core_type<tc>, window_params = [{transform_indices = @transform_0, window_bounds = array<i64: 8, 1>}, {transform_indices = @transform_1, window_bounds = array<i64: 8, 1>}, {transform_indices = @transform_2, window_bounds = array<i64: 8, 1>}, {pipeline_mode = #tpu.pipeline_mode<synchronous>, transform_indices = @transform_3, window_bounds = array<i64: 16, 128>}, {pipeline_mode = #tpu.pipeline_mode<synchronous>, transform_indices = @transform_4, window_bounds = array<i64: 16, 128>}, {transform_indices = @transform_5, window_bounds = array<i64: 1, 1, 128>}]} {
    %0 = arith.index_cast %arg0 : i32 to index
    %1 = memref.load %arg1[%0] : memref<2xi32, #tpu.memory_space<smem>>
    %c0 = arith.constant 0 : index
    %c0_0 = arith.constant 0 : index
    %2 = vector.load %arg2[%c0, %c0_0] : memref<8x1xi32, #tpu.memory_space<vmem>>, vector<8x1xi32>
    %c0_1 = arith.constant 0 : index
    %c0_2 = arith.constant 0 : index
    %3 = vector.load %arg4[%c0_1, %c0_2] : memref<8x1xi32, #tpu.memory_space<vmem>>, vector<8x1xi32>
    %c0_3 = arith.constant 0 : index
    %c0_4 = arith.constant 0 : index
    %4 = vector.load %arg3[%c0_3, %c0_4] : memref<8x1xi32, #tpu.memory_space<vmem>>, vector<8x1xi32>
    %5 = arith.sitofp %4 : vector<8x1xi32> to vector<8x1xf32>
    %6 = tpu.iota {dimensions = array<i32: 0>} : vector<8x1xi32>
    %7 = vector.broadcast %1 : i32 to vector<8x1xi32>
    %8 = arith.cmpi slt, %6, %7 : vector<8x1xi32>
    %9 = arith.extui %8 : vector<8x1xi1> to vector<8x1xi32>
    %10 = arith.sitofp %9 : vector<8x1xi32> to vector<8x1xf32>
    %cst = arith.constant 1.000000e+00 : f32
    %11 = vector.broadcast %cst : f32 to vector<8x1xf32>
    %12 = arith.subf %11, %5 : vector<8x1xf32>
    %13 = arith.mulf %12, %10 : vector<8x1xf32>
    %14 = tpu.iota {dimensions = array<i32: 1>} : vector<8x16xi32>
    %15 = vector.broadcast %2 : vector<8x1xi32> to vector<8x16xi32>
    %16 = arith.cmpi eq, %14, %15 : vector<8x16xi32>
    %17 = arith.extui %16 : vector<8x16xi1> to vector<8x16xi32>
    %18 = arith.sitofp %17 : vector<8x16xi32> to vector<8x16xf32>
    %19 = vector.broadcast %13 : vector<8x1xf32> to vector<8x16xf32>
    %20 = arith.mulf %18, %19 : vector<8x16xf32>
    %c0_5 = arith.constant 0 : index
    %c0_6 = arith.constant 0 : index
    %21 = vector.load %arg5[%c0_5, %c0_6] : memref<16x128xf32, #tpu.memory_space<vmem>>, vector<16x128xf32>
    %cst_7 = arith.constant dense<0.000000e+00> : vector<8x128xf32>
    %22 = tpu.matmul %20, %21, %cst_7 {dimension_numbers = #tpu.dot_dimension_numbers<[1], [0], [0], [1], [0, 0, 1, 1], [], []>} : vector<8x16xf32>, vector<16x128xf32>, vector<8x128xf32> -> vector<8x128xf32>
    %23 = tpu.iota {dimensions = array<i32: 1>} : vector<8x16xi32>
    %24 = vector.broadcast %3 : vector<8x1xi32> to vector<8x16xi32>
    %25 = arith.cmpi eq, %23, %24 : vector<8x16xi32>
    %26 = arith.extui %25 : vector<8x16xi1> to vector<8x16xi32>
    %27 = arith.sitofp %26 : vector<8x16xi32> to vector<8x16xf32>
    %c0_8 = arith.constant 0 : index
    %c0_9 = arith.constant 0 : index
    %28 = vector.load %arg6[%c0_8, %c0_9] : memref<16x128xf32, #tpu.memory_space<vmem>>, vector<16x128xf32>
    %cst_10 = arith.constant dense<0.000000e+00> : vector<8x128xf32>
    %29 = tpu.matmul %27, %28, %cst_10 {dimension_numbers = #tpu.dot_dimension_numbers<[1], [0], [0], [1], [0, 0, 1, 1], [], []>} : vector<8x16xf32>, vector<16x128xf32>, vector<8x128xf32> -> vector<8x128xf32>
    %30 = arith.mulf %22, %29 : vector<8x128xf32>
    %cst_11 = arith.constant dense<0.000000e+00> : vector<128xf32>
    %31 = vector.multi_reduction <add>, %30, %cst_11 [0] : vector<8x128xf32> to vector<128xf32>
    %32 = vector.shape_cast %31 : vector<128xf32> to vector<1x128xf32>
    %33 = vector.shape_cast %32 : vector<1x128xf32> to vector<1x1x128xf32>
    %c0_12 = arith.constant 0 : index
    %c0_13 = arith.constant 0 : index
    %c0_14 = arith.constant 0 : index
    %34 = vector.load %arg7[%c0_12, %c0_13, %c0_14] : memref<1x1x128xf32, #tpu.memory_space<vmem>>, vector<1x1x128xf32>
    tpu.vector_store %arg7[%c0_12, %c0_13, %c0_14], %33 {strides = array<i32>} : memref<1x1x128xf32, #tpu.memory_space<vmem>>, vector<1x1x128xf32>,
    return
  }
  func.func @transform_0(%arg0: i32, %arg1: memref<2xi32, #tpu.memory_space<smem>>) -> (i32, i32) {
    %c0_i32 = arith.constant 0 : i32
    %c0_i32_0 = arith.constant 0 : i32
    return %arg0, %c0_i32 : i32, i32
  }
  func.func @transform_1(%arg0: i32, %arg1: memref<2xi32, #tpu.memory_space<smem>>) -> (i32, i32) {
    %c0_i32 = arith.constant 0 : i32
    %c0_i32_0 = arith.constant 0 : i32
    return %arg0, %c0_i32 : i32, i32
  }
  func.func @transform_2(%arg0: i32, %arg1: memref<2xi32, #tpu.memory_space<smem>>) -> (i32, i32) {
    %c0_i32 = arith.constant 0 : i32
    %c0_i32_0 = arith.constant 0 : i32
    return %arg0, %c0_i32 : i32, i32
  }
  func.func @transform_3(%arg0: i32, %arg1: memref<2xi32, #tpu.memory_space<smem>>) -> (i32, i32) {
    %c0_i32 = arith.constant 0 : i32
    %c0_i32_0 = arith.constant 0 : i32
    %c0_i32_1 = arith.constant 0 : i32
    return %c0_i32, %c0_i32_0 : i32, i32
  }
  func.func @transform_4(%arg0: i32, %arg1: memref<2xi32, #tpu.memory_space<smem>>) -> (i32, i32) {
    %c0_i32 = arith.constant 0 : i32
    %c0_i32_0 = arith.constant 0 : i32
    %c0_i32_1 = arith.constant 0 : i32
    return %c0_i32, %c0_i32_0 : i32, i32
  }
  func.func @transform_5(%arg0: i32, %arg1: memref<2xi32, #tpu.memory_space<smem>>) -> (i32, i32, i32) {
    %c0_i32 = arith.constant 0 : i32
    %c0_i32_0 = arith.constant 0 : i32
    %c0_i32_1 = arith.constant 0 : i32
    return %arg0, %c0_i32, %c0_i32_0 : i32, i32, i32
  }
}

</mosaic_0001>

<bundles_post_ra>
// kernel: tpu_custom_call.1
= control target key start
LH: loop header
LB: loop body
LE: loop exit
PB: predicated region body
PF: predicated region fallthrough
CT: control target
= control target key end

     0   :  { %s849_s0 = inlined_call_operand.vmem [shape: s32[2], index: 0, kind: input, shape index: {}]   ;;  %s850_s1 = inlined_call_operand.vmem [shape: s32[16,1], index: 1, kind: input, shape index: {}]   ;;  %s851_s2 = inlined_call_operand.vmem [shape: s32[16,1], index: 2, kind: input, shape index: {}]   ;;  %s852_s3 = inlined_call_operand.vmem [shape: s32[16,1], index: 3, kind: input, shape index: {}]   ;;  %s853_s4 = inlined_call_operand.vmem [shape: f32[16,128], index: 4, kind: input, shape index: {}]   ;;  %s854_s5 = inlined_call_operand.vmem [shape: f32[16,128], index: 5, kind: input, shape index: {}]   ;;  %s855_s6 = inlined_call_operand.hbm [shape: f32[2,1,128], index: 6, kind: output, shape index: {}]  }
   0x1   :  { %s11_s23 = sshll.u32 %s849_s0, 4  ;;  %s12_s23 = int_to_ptr.vmem [resolvable:$true] %s11_s23 }
   0x2   :  { %s624_s24 = scalar_lea.vmem %s12_s23, 16  ;;  %p629_p1 = scmp.lt.s32.totalorder %s12_s23, %s12_s23 }
   0x3   :  { %p625_p0 = scmp.ne.s32.totalorder %s12_s23, %s624_s24  ;;  %p630_p2 = scmp.lt.s32.totalorder %s624_s24, %s624_s24 }
   0x5   :  { %p631_p3 = por %p630_p2, %p629_p1 }
   0x7   :  { %p632_p4 = pnand %p631_p3, %p625_p0 }
   0x9   :  { %635 = shalt.err (!%p632_p4)  }
   0xa   :  { %s700_s25 = smov [#allocation3]  }
   0xb   :  { %14 = dma.vmem_to_smem %s12_s23, 16, %s700_s25, [#allocation2] }
   0xc   :  { %678 = dma.done.wait [#allocation2], 16 }
   0xd   :  { %679 = vsyncadd [#allocation2], 4294967280 }
   0xe   :  { %16 = sfence }
   0xf   :  { %17 = vsyncpa [#allocation5], 0 }
  0x10   :  { %19 = vsyncpa [#allocation5 + $0x1], 0  ;;  %s743_s26 = smov 0   ;;  %s745_s27 = smov 0  }
  0x11   :  { %s747_s0 = smov 0   ;;  %s749_s28 = smov 0  }
  0x12 LB: > { %s764_s29 = sadd.s32 4294967295, %s698_s28   ;;  %s544_s30 = sadd.s32 4294967294, %s698_s28   ;;  %s698_s28 = sphi %s749_s28, %s861_s28   ;;  %s694_s0 = sphi %s747_s0, %s860_s0   ;;  %s690_s27 = sphi %s745_s27, %s859_s27   ;;  %s686_s26 = sphi %s743_s26, %s858_s26  }
  0x13   : > { %s768_s7 = sadd.s32 1, %s698_s28   ;;  %s152_s8 = sadd.s32 1, %s694_s0 }
  0x14   : > { %s149_s9 = ssub.s32 %s698_s28, %s768_s7  ;;  %p162_p5 = scmp.ne.s32.totalorder %s694_s0, %s690_s27 }
  0x15   : > { %p150_p6 = scmp.eq.s32.totalorder %s149_s9, 0  ;;  %p163_p7 = scmp.eq.s32.totalorder %s764_s29, 1 }
  0x16   : > { %p168_p8 = scmp.ne.s32.totalorder %s690_s27, %s686_s26  ;;  %p169_p9 = scmp.eq.s32.totalorder %s544_s30, 1 }
  0x17   : > { %s779_s10 = scalar_select %p150_p6, %s694_s0, %s152_s8  }
  0x18   : > { %p781_p10 = por %p163_p7, %p162_p5  ;;  %p785_p11 = por %p169_p9, %p168_p8 }
  0x19   : > { %p547_p12 = scmp.ge.s32.totalorder %s698_s28, 1  ;;  %p214_p13 = scmp.lt.s32.totalorder %s698_s28, 3 }
  0x1b   : > { %p215_p0 = pnand %p547_p12, %p214_p13 }
  0x1c   : > { %p248_p1 = scmp.lt.s32.totalorder (!%p215_p0), %s764_s29, 1  ;;  %s260_s13 = sld [smem:[#allocation3 + %s764_s29]] (!%p215_p0) }
  0x1d   : > { %218 = sbr.rel (%p215_p0) target bundleno = 392 (0x188), region = 40  ;;  %s704_s30 = smov (!%p215_p0), [#allocation4]  }
  0x1e   : > { %s640_s8 = sshll.u32 (!%p215_p0), %s704_s30, 4  ;;  %s641_s8 = int_to_ptr.vmem [resolvable:$false] %s640_s8 }
  0x22   : > { %v265_v0 = vlaneseq  ;;  %v701_v1 = vmov 0   ;;  %s249_s14 = scalar_select %p248_p1, %s764_s29, 1  ;;  %v702_v2 = vmov 0.0   ;;  %v370_v4 = vld [vmem:[%s854_s5 + $0x8] sm:$0xff]  ;;  %v369_v6 = vld [vmem:[%s854_s5] sm:$0xff]  ;;  %v267_v9 = vstv %s260_s13 }
  0x23   : > { %622 = vset.pattern.permute.xlu0 %v701_v1  ;;  %623 = vset.pattern.permute.xlu1 %v701_v1  ;;  %v288_v5 = vld [vmem:[%s853_s4 + $0x8] sm:$0xff]  ;;  %vm703_vm1 = vmmov 0   ;;  %v287_v14 = vld [vmem:[%s853_s4] sm:$0xff]  ;;  %vm289_vm2 = vcmask 130048   ;;  %s246_s13 = sand.u32 1, %s690_s27  }
  0x24   : > { %572 = vmatprep.subr.mxu1 %v702_v2  ;;  %565 = vmatprep.subr.mxu0 %v702_v2  ;;  %v266_v3 = vshrl.u32 %v265_v0, 7  ;;  %s548_s17 = sshll.u32 %s249_s14, 3  ;;  %v274_v16 = vand.u32 127, %v265_v0  ;;  %s247_s19 = scalar_lea.vmem [#allocation4], %s246_s13 }
  0x25   : > { %573 = vmatpush3.msra.mxu1 %v370_v4  ;;  %s251_s20 = scalar_lea.vmem %s850_s1, %s548_s17  ;;  %s255_s23 = scalar_lea.vmem %s851_s2, %s548_s17  ;;  %566 = vmatpush3.msra.mxu0 %v288_v5 }
  0x26   : > { %574 = vmatprep.subr.mxu1 %v702_v2  ;;  %v261_v7 = vld [vmem:[%s251_s20] sm:$0xff]  ;;  %s259_s15 = scalar_lea.vmem %s852_s3, %s548_s17  ;;  %vm268_vm0 = vcmp.lt.s32.totalorder %v266_v3, %v267_v9  ;;  %576 = vmatprep.mubr.msk.f32.mxu1 %vm703_vm1, %v702_v2  ;;  %s556_s17 = sshll.u32 %s764_s29, 4 }
  0x27   : > { %v263_v8 = vld [vmem:[%s255_s23] sm:$0xff]  ;;  %575 = vmatpush3.msra.mxu1 %v369_v6  ;;  %276 = vperm.xlu0 %622, %v261_v7   ;;  %v551_v12 = vsel %vm268_vm0, 1.0, %v702_v2  ;;  %s465_s20 = sshll.u32 %s247_s19, 4  ;;  %s463_s23 = scalar_lea.hbm %s855_s6, %s556_s17  ;;  %s466_s20 = int_to_ptr.vmem [resolvable:$true] %s465_s20 }
  0x28   : > { %v264_v10 = vcvt.s32.f32 %v263_v8  ;;  %v262_v11 = vld [vmem:[%s259_s15] sm:$0xff]  ;;  %567 = vmatprep.subr.mxu0 %v702_v2  ;;  %569 = vmatprep.mubr.msk.f32.mxu0 %vm703_vm1, %v702_v2  ;;  %s453_s24 = scalar_lea.sflag [#allocation5], %s246_s13  ;;  %s636_s25 = scalar_lea.vmem %s466_s20, 16 }
  0x29   : > { %364 = vperm.xlu1 %623, %v262_v11   ;;  %568 = vmatpush3.msra.mxu0 %v287_v14  ;;  %p637_p2 = scmp.ne.s32.totalorder %s466_s20, %s636_s25  ;;  %s642_s29 = scalar_lea.vmem %s641_s8, 32 }
  0x2a   : > { %v271_v13 = vsub.f32 1.0, %v264_v10  ;;  %p643_p5 = scmp.lt.s32.totalorder %s466_s20, %s641_s8  ;;  %p644_p6 = scmp.lt.s32.totalorder %s642_s29, %s636_s25 }
  0x2b   : > { %p638_p3 = pnand %p637_p2, %p781_p10 }
  0x2c   : > { %v272_v15 = vmul.f32 %v551_v12, %v271_v13  ;;  %p645_p7 = por %p644_p6, %p643_p5 }
  0x2d   : > { %p639_p4 = pneg %p638_p3 }
  0x2e   : > { %283 = vperm.xlu0 %622, %v272_v15  }
  0x2f   : > { %p646_p8 = pnand %p645_p7, %p639_p4 }
  0xa2   : > { %v277_v17 = vpop.permute.xlu0 %276 }
  0xa3   : > { %vm278_vm4 = vcmp.eq.s32.totalorder %v274_v16, %v277_v17 }
  0xa4   : > { %v365_v18 = vpop.permute.xlu1 %364  ;;  %v552_v20 = vsel %vm278_vm4, 1.0, %v702_v2 }
  0xa5   : > { %vm366_vm3 = vcmp.eq.s32.totalorder %v274_v16, %v365_v18 }
  0xa6   : > { %v554_v19 = vsel %vm366_vm3, 1.0, %v702_v2 }
  0xa7   : > { %577 = vmatmul.mubr.msk.f32.vlgmr.msra.gmra.mxu1 %vm289_vm2, %v554_v19 }
  0xa9   : > { %v284_v21 = vpop.permute.xlu0 %283 }
  0xaa   : > { %v286_v22 = vmul.f32 %v552_v20, %v284_v21 }
  0xac   : > { %570 = vmatmul.mubr.msk.f32.vlgmr.msra.gmra.mxu0 %vm289_vm2, %v286_v22 }
 0x167   : > { %v440_v23 = vpop.f32.mrf.mxu1 }
 0x169   : > { %v578_v24 = vpop.f32.mrf.mxu1 }
 0x16c   : > { %v359_v25 = vpop.f32.mrf.mxu0 }
 0x16d   : > { %v444_v26 = vmul.f32 %v440_v23, %v359_v25 }
 0x16e   : > { %v571_v27 = vpop.f32.mrf.mxu0 }
 0x16f   : > { %v445_v28 = vrot.slane %v444_v26, 4 }
 0x171   : > { %v446_v29 = vadd.f32 %v445_v28, %v444_v26 }
 0x173   : > { %v447_v30 = vrot.slane %v446_v29, 2 }
 0x175   : > { %v448_v31 = vadd.f32 %v447_v30, %v446_v29 }
 0x177   : > { %v449_v32 = vrot.slane %v448_v31, 1 }
 0x179   : > { %v450_v33 = vadd.f32 %v449_v32, %v448_v31 }
 0x17b   : > { %451 = vst [vmem:[%s247_s19] sm:$0x1] %v450_v33 }
 0x17c   : > { %649 = shalt.err (!%p646_p8)
}
 0x17d   : > { %s650_s9 = scalar_lea.hbm %s463_s23, 16  ;;  %s654_s16 = scalar_lea.hbm %s855_s6, 32 }
 0x17e   : > { %p651_p9 = scmp.ne.s32.totalorder %s463_s23, %s650_s9  ;;  %p655_p0 = scmp.lt.s32.totalorder %s463_s23, %s855_s6 }
 0x17f   : > { %p656_p1 = scmp.lt.s32.totalorder %s654_s16, %s650_s9 }
 0x180   : > { %p652_p12 = pnand %p651_p9, %p781_p10 }
 0x181   : > { %p657_p2 = por %p656_p1, %p655_p0 }
 0x182   : > { %p653_p13 = pneg %p652_p12 }
 0x184   : > { %p658_p3 = pnand %p657_p2, %p653_p13 }
 0x186   : > { %661 = shalt.err (!%p658_p3)
}
 0x187   : > { %579 = dma.vmem_to_hbm [thread:$0]  (%p781_p10), %s466_s20, 16, %s463_s23, %s453_s24  }
 0x188 PF: > { %p585_p4 = scmp.ge.s32.totalorder %s698_s28, 2  ;;  %s477_s17 = sand.u32 1, %s686_s26  }
 0x189   : > { %s478_s19 = scalar_lea.sflag [#allocation5], %s477_s17 }
 0x18a   : > { %p582_p5 = pnand %p585_p4, %p785_p11 }
 0x18c   : > { %p583_p6 = pneg %p582_p5 }
 0x18e   : > { %681 = dma.done.wait (%p583_p6), %s478_s19, 16  }
 0x18f   : > { %683 = vsyncadd (%p583_p6), %s478_s19, 4294967280  ;;  %p22_p7 = scmp.ge.s32.totalorder %s768_s7, 4   ;;  %s858_s26 = smov %s690_s27 }
 0x190   : > { %s859_s27 = smov %s694_s0  ;;  %s860_s0 = smov %s779_s10 }
 0x191   : > { %s861_s28 = smov %s768_s7  ;;  %24 = sbr.rel (!%p22_p7) target bundleno = 18 (0x12), region = 81 }
 0x196   :  { %482 = vsyncpa [#allocation5], 1 }
 0x197   :  { %484 = vsyncpa [#allocation5 + $0x1], 1 }

</bundles_post_ra>
